<compile_context>
chip_gen: v7x
topology: tpu7x:2x2x1
jax: 0.10.0
libtpu: 0.0.40
codegen_flags: <defaults>
</compile_context>

<pallas_src>
import functools

import jax
import jax.numpy as jnp
from jax.experimental import pallas as pl
from jax.experimental.pallas import tpu as pltpu

H_PAD = 128   # hidden (25) padded to a full 128-lane width
A_PAD = 128   # action_dim padded to a full 128-lane width (lane-dense output)


def _round8(n: int) -> int:
    return ((n + 7) // 8) * 8


def _actor_kernel(x_ref, p_ref, o_ref, *, sd, offs):
    """One batch tile: three MXU matmuls + VPU relus, all 128 lanes wide."""
    ow1, ob1, ow2, ob2, ow3, ob3 = offs
    x = x_ref[...]

    # Static, 8-aligned views into the packed parameter slab (zero-cost).
    w1 = p_ref[ow1:ow1 + sd, :]
    b1 = p_ref[ob1:ob1 + 1, :]
    w2 = p_ref[ow2:ow2 + H_PAD, :]
    b2 = p_ref[ob2:ob2 + 1, :]
    w3 = p_ref[ow3:ow3 + H_PAD, :]   # max_action already folded in
    b3 = p_ref[ob3:ob3 + 1, :]

    a = jnp.maximum(jnp.dot(x, w1, preferred_element_type=jnp.float32) + b1, 0.0)
    a = jnp.maximum(jnp.dot(a, w2, preferred_element_type=jnp.float32) + b2, 0.0)
    a = jnp.maximum(jnp.dot(a, w3, preferred_element_type=jnp.float32) + b3, 0.0)
    o_ref[...] = a.astype(o_ref.dtype)


def prepare_actor(params, max_action):
    """One-time parameter transform: pad, fold max_action, pack into one slab."""
    w1, b1, w2, b2, w3, b3 = params
    state_dim, _hidden = w1.shape
    action_dim = w3.shape[1]

    max_action = float(max_action)
    if max_action > 0.0:
        # Positive scale commutes with ReLU: m * relu(z) == relu(m * z).
        w3 = w3 * jnp.float32(max_action)
        b3 = b3 * jnp.float32(max_action)
        residual_scale = 1.0
    else:
        residual_scale = max_action  # applied outside the kernel

    def pad2(a, rows, cols):
        a = a.astype(jnp.float32)
        return jnp.pad(a, ((0, rows - a.shape[0]), (0, cols - a.shape[1])))

    segs = [
        pad2(w1, state_dim, H_PAD),
        pad2(b1, 1, H_PAD),
        pad2(w2, H_PAD, H_PAD),
        pad2(b2, 1, H_PAD),
        pad2(w3, H_PAD, A_PAD),
        pad2(b3, 1, A_PAD),
    ]

    # Lay segments out at 8-aligned (sublane-aligned) row offsets.
    offs, chunks, rows = [], [], 0
    for s in segs:
        offs.append(rows)
        r8 = _round8(s.shape[0])
        chunks.append(jnp.pad(s, ((0, r8 - s.shape[0]), (0, 0))))
        rows += r8
    slab = jnp.concatenate(chunks, axis=0)  # single contiguous param DMA

    meta = dict(state_dim=state_dim, action_dim=action_dim,
                offs=tuple(offs), residual_scale=residual_scale)
    return slab, meta


def actor_forward(state, slab, meta):
    """state: [B, state_dim] f32 -> [B, action_dim] f32."""
    B, sd = state.shape
    assert sd == meta["state_dim"]
    action_dim = meta["action_dim"]

    # Row-tile the batch; large tiles amortize the ~0.35us/step overhead,
    # small batches collapse to a single (8-row-aligned) tile.
    TB = 512 if B >= 512 else max(8, _round8(B))
    B_pad = pl.cdiv(B, TB) * TB
    x = state if B_pad == B else jnp.pad(state, ((0, B_pad - B), (0, 0)))

    kernel = functools.partial(_actor_kernel, sd=sd, offs=meta["offs"])
    out = pl.pallas_call(
        kernel,
        out_shape=jax.ShapeDtypeStruct((B_pad, A_PAD), jnp.float32),
        grid=(B_pad // TB,),
        in_specs=[
            pl.BlockSpec((TB, sd), lambda i: (i, 0)),          # batch tile
            pl.BlockSpec(slab.shape, lambda i: (0, 0)),        # resident weights
        ],
        out_specs=pl.BlockSpec((TB, A_PAD), lambda i: (i, 0)),  # lane-dense
        compiler_params=pltpu.CompilerParams(
            dimension_semantics=("parallel",)),
    )(x, slab)

    out = out[:B, :action_dim]
    if meta["residual_scale"] != 1.0:
        out = meta["residual_scale"] * out
    return out


def init_actor_params(key, state_dim, action_dim, hidden=25):
    # Deterministic synthetic init (PyTorch-style uniform fan-in bounds).
    # Weights stored as [in, out] so the kernel computes x @ W + b.
    ks = jax.random.split(key, 6)

    def uni(k, shape, fan_in):
        bound = 1.0 / jnp.sqrt(fan_in)
        return jax.random.uniform(k, shape, jnp.float32, -bound, bound)

    w1 = uni(ks[0], (state_dim, hidden), state_dim)
    b1 = uni(ks[1], (1, hidden), state_dim)
    w2 = uni(ks[2], (hidden, hidden), hidden)
    b2 = uni(ks[3], (1, hidden), hidden)
    w3 = uni(ks[4], (hidden, action_dim), hidden)
    b3 = uni(ks[5], (1, action_dim), hidden)
    return (w1, b1, w2, b2, w3, b3)


def actor_ref(state, params, max_action):
    # Pure-JAX reference for correctness checking (matches the PyTorch spec).
    w1, b1, w2, b2, w3, b3 = params
    a = jnp.maximum(state @ w1 + b1, 0.0)
    a = jnp.maximum(a @ w2 + b2, 0.0)
    return max_action * jnp.maximum(a @ w3 + b3, 0.0)


if __name__ == "__main__":
    key = jax.random.PRNGKey(0)
    k_params, k_state = jax.random.split(key)

    batch = 2
    state_dim = 16
    action_dim = 4
    max_action = 2.0

    params = init_actor_params(k_params, state_dim, action_dim)
    state = jax.random.normal(k_state, (batch, state_dim), jnp.float32)

    slab, meta = prepare_actor(params, max_action)
    out = actor_forward(state, slab, meta)
    out = jax.block_until_ready(out)

    ref = actor_ref(state, params, max_action)
    assert out.shape == (batch, action_dim)
    assert jnp.allclose(out, ref, atol=1e-5, rtol=1e-5)

    print("KERNEL_OK")
</pallas_src>

<mosaic_0001>
module attributes {stable_mosaic.version = 11 : i64} {
  func.func @_actor_kernel(%arg0: i32, %arg1: memref<8x16xf32, #tpu.memory_space<vmem>>, %arg2: memref<296x128xf32, #tpu.memory_space<vmem>>, %arg3: memref<8x128xf32, #tpu.memory_space<vmem>>) attributes {dimension_semantics = [#tpu.dimension_semantics<parallel>], iteration_bounds = array<i64: 1>, scalar_prefetch = 0 : i64, scratch_operands = 0 : i64, tpu.core_type = #tpu.core_type<tc>, window_params = [{transform_indices = @transform_0, window_bounds = array<i64: 8, 16>}, {pipeline_mode = #tpu.pipeline_mode<synchronous>, transform_indices = @transform_1, window_bounds = array<i64: 296, 128>}, {transform_indices = @transform_2, window_bounds = array<i64: 8, 128>}]} {
    %c0 = arith.constant 0 : index
    %c0_0 = arith.constant 0 : index
    %0 = vector.load %arg1[%c0, %c0_0] : memref<8x16xf32, #tpu.memory_space<vmem>>, vector<8x16xf32>
    %c0_1 = arith.constant 0 : index
    %c0_2 = arith.constant 0 : index
    %1 = vector.load %arg2[%c0_1, %c0_2] : memref<296x128xf32, #tpu.memory_space<vmem>>, vector<16x128xf32>
    %c16 = arith.constant 16 : index
    %c0_3 = arith.constant 0 : index
    %2 = vector.load %arg2[%c16, %c0_3] : memref<296x128xf32, #tpu.memory_space<vmem>>, vector<1x128xf32>
    %c24 = arith.constant 24 : index
    %c0_4 = arith.constant 0 : index
    %3 = vector.load %arg2[%c24, %c0_4] : memref<296x128xf32, #tpu.memory_space<vmem>>, vector<128x128xf32>
    %c152 = arith.constant 152 : index
    %c0_5 = arith.constant 0 : index
    %4 = vector.load %arg2[%c152, %c0_5] : memref<296x128xf32, #tpu.memory_space<vmem>>, vector<1x128xf32>
    %c160 = arith.constant 160 : index
    %c0_6 = arith.constant 0 : index
    %5 = vector.load %arg2[%c160, %c0_6] : memref<296x128xf32, #tpu.memory_space<vmem>>, vector<128x128xf32>
    %c288 = arith.constant 288 : index
    %c0_7 = arith.constant 0 : index
    %6 = vector.load %arg2[%c288, %c0_7] : memref<296x128xf32, #tpu.memory_space<vmem>>, vector<1x128xf32>
    %cst = arith.constant dense<0.000000e+00> : vector<8x128xf32>
    %7 = tpu.matmul %0, %1, %cst {dimension_numbers = #tpu.dot_dimension_numbers<[1], [0], [0], [1], [0, 0, 1, 1], [], []>} : vector<8x16xf32>, vector<16x128xf32>, vector<8x128xf32> -> vector<8x128xf32>
    %8 = vector.broadcast %2 : vector<1x128xf32> to vector<8x128xf32>
    %9 = arith.addf %7, %8 : vector<8x128xf32>
    %cst_8 = arith.constant 0.000000e+00 : f32
    %10 = vector.broadcast %cst_8 : f32 to vector<8x128xf32>
    %11 = arith.maximumf %9, %10 : vector<8x128xf32>
    %cst_9 = arith.constant dense<0.000000e+00> : vector<8x128xf32>
    %12 = tpu.matmul %11, %3, %cst_9 {dimension_numbers = #tpu.dot_dimension_numbers<[1], [0], [0], [1], [0, 0, 1, 1], [], []>} : vector<8x128xf32>, vector<128x128xf32>, vector<8x128xf32> -> vector<8x128xf32>
    %13 = vector.broadcast %4 : vector<1x128xf32> to vector<8x128xf32>
    %14 = arith.addf %12, %13 : vector<8x128xf32>
    %cst_10 = arith.constant 0.000000e+00 : f32
    %15 = vector.broadcast %cst_10 : f32 to vector<8x128xf32>
    %16 = arith.maximumf %14, %15 : vector<8x128xf32>
    %cst_11 = arith.constant dense<0.000000e+00> : vector<8x128xf32>
    %17 = tpu.matmul %16, %5, %cst_11 {dimension_numbers = #tpu.dot_dimension_numbers<[1], [0], [0], [1], [0, 0, 1, 1], [], []>} : vector<8x128xf32>, vector<128x128xf32>, vector<8x128xf32> -> vector<8x128xf32>
    %18 = vector.broadcast %6 : vector<1x128xf32> to vector<8x128xf32>
    %19 = arith.addf %17, %18 : vector<8x128xf32>
    %cst_12 = arith.constant 0.000000e+00 : f32
    %20 = vector.broadcast %cst_12 : f32 to vector<8x128xf32>
    %21 = arith.maximumf %19, %20 : vector<8x128xf32>
    %c0_13 = arith.constant 0 : index
    %c0_14 = arith.constant 0 : index
    %22 = vector.load %arg3[%c0_13, %c0_14] : memref<8x128xf32, #tpu.memory_space<vmem>>, vector<8x128xf32>
    tpu.vector_store %arg3[%c0_13, %c0_14], %21 {strides = array<i32>} : memref<8x128xf32, #tpu.memory_space<vmem>>, vector<8x128xf32>,
    return
  }
  func.func @transform_0(%arg0: i32) -> (i32, i32) {
    %c0_i32 = arith.constant 0 : i32
    %c0_i32_0 = arith.constant 0 : i32
    return %arg0, %c0_i32 : i32, i32
  }
  func.func @transform_1(%arg0: i32) -> (i32, i32) {
    %c0_i32 = arith.constant 0 : i32
    %c0_i32_0 = arith.constant 0 : i32
    %c0_i32_1 = arith.constant 0 : i32
    return %c0_i32, %c0_i32_0 : i32, i32
  }
  func.func @transform_2(%arg0: i32) -> (i32, i32) {
    %c0_i32 = arith.constant 0 : i32
    %c0_i32_0 = arith.constant 0 : i32
    return %arg0, %c0_i32 : i32, i32
  }
}

</mosaic_0001>

<bundles_post_ra>
// kernel: tpu_custom_call.1
= control target key start
LH: loop header
LB: loop body
LE: loop exit
PB: predicated region body
PF: predicated region fallthrough
CT: control target
= control target key end

     0   :  { %7 = vsyncpa [#allocation3], 0  ;;  %s657_s0 = inlined_call_operand.hbm [shape: f32[8,16], index: 0, kind: input, shape index: {}]   ;;  %s658_s1 = inlined_call_operand.hbm [shape: f32[296,128], index: 1, kind: input, shape index: {}]   ;;  %s659_s2 = inlined_call_operand.hbm [shape: f32[8,128], index: 2, kind: output, shape index: {}]  }
   0x1   :  { %8 = vsyncpa [#allocation6], 0 }
   0x2   :  { %9 = vsyncpa [#allocation4], 0  ;;  %s571_s9 = smov [#allocation2]   ;;  %s572_s11 = smov [#allocation5]  }
   0x3   :  { %s16_s10 = sshll.u32 %s571_s9, 4  ;;  %s25_s12 = sshll.u32 %s572_s11, 4  ;;  %s17_s10 = int_to_ptr.vmem [resolvable:$true] %s16_s10  ;;  %s594_s12 = int_to_ptr.vmem [resolvable:$true] %s25_s12 }
   0x4   :  { %s499_s15 = scalar_lea.hbm %s657_s0, 128 }
   0x5   :  { %p500_p0 = scmp.ne.s32.totalorder %s657_s0, %s499_s15  ;;  %p503_p1 = scmp.lt.u32.totalorder %s499_s15, %s657_s0 }
   0x7   :  { %p505_p2 = pnand %p503_p1, %p500_p0 }
   0x9   :  { %508 = shalt.err (!%p505_p2)
}
   0xa   :  { %s509_s20 = scalar_lea.vmem %s17_s10, 128  ;;  %p514_p4 = scmp.lt.s32.totalorder %s17_s10, %s17_s10 }
   0xb   :  { %p510_p3 = scmp.ne.s32.totalorder %s17_s10, %s509_s20  ;;  %p515_p5 = scmp.lt.s32.totalorder %s509_s20, %s509_s20 }
   0xd   :  { %p516_p6 = por %p515_p5, %p514_p4 }
   0xf   :  { %p517_p7 = pnand %p516_p6, %p510_p3 }
  0x11   :  { %520 = shalt.err (!%p517_p7)
}
  0x12   :  { %19 = dma.hbm_to_vmem [thread:$0]  %s657_s0, 128, %s17_s10, [#allocation3]  }
  0x13   :  { %s521_s25 = scalar_lea.hbm %s658_s1, 4736 }
  0x14   :  { %p522_p8 = scmp.ne.s32.totalorder %s658_s1, %s521_s25  ;;  %p525_p9 = scmp.lt.u32.totalorder %s521_s25, %s658_s1 }
  0x16   :  { %p527_p10 = pnand %p525_p9, %p522_p8 }
  0x18   :  { %530 = shalt.err (!%p527_p10)
}
  0x19   :  { %s531_s30 = scalar_lea.vmem %s594_s12, 4736  ;;  %p536_p12 = scmp.lt.s32.totalorder %s594_s12, %s594_s12 }
  0x1a   :  { %p532_p11 = scmp.ne.s32.totalorder %s594_s12, %s531_s30  ;;  %p537_p13 = scmp.lt.s32.totalorder %s531_s30, %s531_s30 }
  0x1c   :  { %p538_p0 = por %p537_p13, %p536_p12 }
  0x1e   :  { %p539_p1 = pnand %p538_p0, %p532_p11 }
  0x20   :  { %542 = shalt.err (!%p539_p1)
}
  0x21   :  { %s573_s0 = smov 128   ;;  %s574_s3 = smov 8  }
  0x22   :  { %31 = dma.hbm_to_vmem [thread:$0]  %s658_s1, 4736, %s594_s12, [#allocation6], %s573_s0, %s573_s0, %s574_s3  }
  0x23   :  { %565 = dma.done.wait [#allocation3], 128  }
  0x24   :  { %566 = vsyncadd [#allocation3], 4294967168 }
  0x25   :  { %567 = dma.done.wait [#allocation6], 4736  }
  0x26   :  { %568 = vsyncadd [#allocation6], 4294962560  ;;  %v575_v0 = vmov 0.0|0.0   ;;  %vm576_vm0 = vmmov 0   ;;  %v577_v1 = vmov 0.0   ;;  %v39_v2 = vld [vmem:[#allocation5] sm:$0xff] }
  0x27   :  { %440 = vmatprep.subr.bf16.mxu0 %v575_v0  ;;  %367 = vmatprep.mubr.msk.f32.mxu0 %vm576_vm0, %v577_v1  ;;  %v40_v3 = vld [vmem:[#allocation5 + $0x8] sm:$0xff]  ;;  %v42_v5 = vld [vmem:[#allocation5 + $0x18] sm:$0xff]  ;;  %v43_v6 = vld [vmem:[#allocation5 + $0x20] sm:$0xff]  ;;  %vm80_vm1 = vcmask 130048   ;;  %s578_s1 = smov [#allocation7]  }
  0x28   :  { %443 = vmatprep.subr.bf16.mxu1 %v575_v0  ;;  %402 = vmatprep.mubr.msk.f32.mxu1 %vm576_vm0, %v577_v1  ;;  %v441_v4 = vpack.c.bf16 %v40_v3, %v39_v2  ;;  %v44_v7 = vld [vmem:[#allocation5 + $0x28] sm:$0xff]  ;;  %v444_v8 = vpack.c.bf16 %v43_v6, %v42_v5  ;;  %v45_v9 = vld [vmem:[#allocation5 + $0x30] sm:$0xff]  ;;  %v38_v10 = vld [vmem:[#allocation2] sm:$0xff]  ;;  %s312_s6 = sshll.u32 %s578_s1, 4  ;;  %s313_s6 = int_to_ptr.vmem [resolvable:$true] %s312_s6 }
  0x29   :  { %v447_v11 = vpack.c.bf16 %v45_v9, %v44_v7  ;;  %v46_v12 = vld [vmem:[#allocation5 + $0x38] sm:$0xff]  ;;  %v47_v13 = vld [vmem:[#allocation5 + $0x40] sm:$0xff]  ;;  %v48_v15 = vld [vmem:[#allocation5 + $0x48] sm:$0xff]  ;;  %s543_s7 = scalar_lea.vmem %s313_s6, 128  ;;  %p548_p3 = scmp.lt.s32.totalorder %s313_s6, %s313_s6 }
  0x2a   :  { %442 = vmatpush3.bf16.msra.mxu0 %v441_v4  ;;  %445 = vmatpush3.bf16.msra.mxu1 %v444_v8  ;;  %v450_v14 = vpack.c.bf16 %v47_v13, %v46_v12  ;;  %v49_v16 = vld [vmem:[#allocation5 + $0x50] sm:$0xff]  ;;  %v50_v18 = vld [vmem:[#allocation5 + $0x58] sm:$0xff]  ;;  %v51_v19 = vld [vmem:[#allocation5 + $0x60] sm:$0xff]  ;;  %p544_p2 = scmp.ne.s32.totalorder %s313_s6, %s543_s7  ;;  %p549_p4 = scmp.lt.s32.totalorder %s543_s7, %s543_s7 }
  0x2b   :  { %467 = vmatprep.subr.bf16.mxu0 %v575_v0  ;;  %446 = vmatprep.subr.bf16.mxu1 %v575_v0  ;;  %v453_v17 = vpack.c.bf16 %v49_v16, %v48_v15  ;;  %v456_v20 = vpack.c.bf16 %v51_v19, %v50_v18  ;;  %v52_v21 = vld [vmem:[#allocation5 + $0x68] sm:$0xff]  ;;  %v53_v22 = vld [vmem:[#allocation5 + $0x70] sm:$0xff]  ;;  %v54_v24 = vld [vmem:[#allocation5 + $0x78] sm:$0xff] }
  0x2c   :  { %v459_v23 = vpack.c.bf16 %v53_v22, %v52_v21  ;;  %v55_v25 = vld [vmem:[#allocation5 + $0x80] sm:$0xff]  ;;  %v56_v27 = vld [vmem:[#allocation5 + $0x88] sm:$0xff]  ;;  %v57_v28 = vld [vmem:[#allocation5 + $0x90] sm:$0xff]  ;;  %p550_p5 = por %p549_p4, %p548_p3 }
  0x2d   :  { %368 = vmatmul.mubr.msk.f32.vlgmr.msra.gmra.mrb[0].mxu0 %vm80_vm1, %v38_v10  ;;  %v462_v26 = vpack.c.bf16 %v55_v25, %v54_v24  ;;  %v465_v29 = vpack.c.bf16 %v57_v28, %v56_v27  ;;  %v59_v30 = vld [vmem:[#allocation5 + $0xa0] sm:$0xff]  ;;  %v60_v31 = vld [vmem:[#allocation5 + $0xa8] sm:$0xff]  ;;  %v61_v32 = vld [vmem:[#allocation5 + $0xb0] sm:$0xff] }
  0x2e   :  { %437 = vmatprep.mubr.msk.f32.mxu0 %vm576_vm0, %v577_v1  ;;  %448 = vmatpush3.bf16.msra.mxu1 %v447_v11  ;;  %v468_v33 = vpack.c.bf16 %v60_v31, %v59_v30  ;;  %v62_v34 = vld [vmem:[#allocation5 + $0xb8] sm:$0xff]  ;;  %v63_v36 = vld [vmem:[#allocation5 + $0xc0] sm:$0xff]  ;;  %v64_v37 = vld [vmem:[#allocation5 + $0xc8] sm:$0xff]  ;;  %p551_p6 = pnand %p550_p5, %p544_p2 }
  0x2f   :  { %449 = vmatprep.subr.bf16.mxu1 %v575_v0  ;;  %v471_v35 = vpack.c.bf16 %v62_v34, %v61_v32  ;;  %v474_v38 = vpack.c.bf16 %v64_v37, %v63_v36  ;;  %v65_v39 = vld [vmem:[#allocation5 + $0xd0] sm:$0xff]  ;;  %v66_v40 = vld [vmem:[#allocation5 + $0xd8] sm:$0xff]  ;;  %v67_v42 = vld [vmem:[#allocation5 + $0xe0] sm:$0xff] }
  0x30   :  { %469 = vmatpush3.bf16.msra.mxu0 %v468_v33  ;;  %v477_v41 = vpack.c.bf16 %v66_v40, %v65_v39  ;;  %v68_v43 = vld [vmem:[#allocation5 + $0xe8] sm:$0xff]  ;;  %v69_v45 = vld [vmem:[#allocation5 + $0xf0] sm:$0xff]  ;;  %v70_v46 = vld [vmem:[#allocation5 + $0xf8] sm:$0xff] }
  0x31   :  { %470 = vmatprep.subr.bf16.mxu0 %v575_v0  ;;  %v480_v44 = vpack.c.bf16 %v68_v43, %v67_v42  ;;  %v483_v47 = vpack.c.bf16 %v70_v46, %v69_v45  ;;  %v71_v48 = vld [vmem:[#allocation5 + $0x100] sm:$0xff]  ;;  %v72_v49 = vld [vmem:[#allocation5 + $0x108] sm:$0xff]  ;;  %v322_v51 = vld [vmem:[#allocation5 + $0x10] ss:$0 sm:$0xff] }
  0x32   :  { %451 = vmatpush3.bf16.msra.mxu1 %v450_v14  ;;  %v486_v50 = vpack.c.bf16 %v72_v49, %v71_v48  ;;  %v73_v56 = vld [vmem:[#allocation5 + $0x110] sm:$0xff]  ;;  %v74_v57 = vld [vmem:[#allocation5 + $0x118] sm:$0xff]  ;;  %v325_v1 = vld [vmem:[#allocation5 + $0x120] ss:$0 sm:$0xff] }
  0x33   :  { %452 = vmatprep.subr.bf16.mxu1 %v575_v0  ;;  %v489_v58 = vpack.c.bf16 %v74_v57, %v73_v56  ;;  %v324_v59 = vld [vmem:[#allocation5 + $0x98] ss:$0 sm:$0xff] }
  0x34   :  { %472 = vmatpush3.bf16.msra.mxu0 %v471_v35 }
  0x35   :  { %473 = vmatprep.subr.bf16.mxu0 %v575_v0 }
  0x36   :  { %454 = vmatpush3.bf16.msra.mxu1 %v453_v17 }
  0x37   :  { %455 = vmatprep.subr.bf16.mxu1 %v575_v0 }
  0x38   :  { %475 = vmatpush3.bf16.msra.mxu0 %v474_v38 }
  0x39   :  { %476 = vmatprep.subr.bf16.mxu0 %v575_v0 }
  0x3a   :  { %457 = vmatpush3.bf16.msra.mxu1 %v456_v20 }
  0x3b   :  { %458 = vmatprep.subr.bf16.mxu1 %v575_v0 }
  0x3c   :  { %478 = vmatpush3.bf16.msra.mxu0 %v477_v41 }
  0x3d   :  { %479 = vmatprep.subr.bf16.mxu0 %v575_v0 }
  0x3e   :  { %460 = vmatpush3.bf16.msra.mxu1 %v459_v23 }
  0x3f   :  { %461 = vmatprep.subr.bf16.mxu1 %v575_v0 }
  0x40   :  { %481 = vmatpush3.bf16.msra.mxu0 %v480_v44 }
  0x41   :  { %482 = vmatprep.subr.bf16.mxu0 %v575_v0 }
  0x42   :  { %463 = vmatpush3.bf16.msra.mxu1 %v462_v26 }
  0x43   :  { %464 = vmatprep.subr.bf16.mxu1 %v575_v0 }
  0x44   :  { %484 = vmatpush3.bf16.msra.mxu0 %v483_v47 }
  0x45   :  { %485 = vmatprep.subr.bf16.mxu0 %v575_v0 }
  0x46   :  { %466 = vmatpush3.bf16.msra.mxu1 %v465_v29 }
  0x48   :  { %487 = vmatpush3.bf16.msra.mxu0 %v486_v50 }
  0x49   :  { %488 = vmatprep.subr.bf16.mxu0 %v575_v0 }
  0x4c   :  { %490 = vmatpush3.bf16.msra.mxu0 %v489_v58 }
 0x100   :  { %v150_v52 = vpop.f32.mrb[0].mxu0 }
 0x101   :  { %v151_v53 = vadd.f32 %v322_v51, %v150_v52  ;;  %v369_v54 = vpop.f32.mrb[1].mxu0 }
 0x103   :  { %v154_v55 = vmax.f32 %v151_v53, 0.0 }
 0x105   :  { %403 = vmatmul.mubr.f32.vlgmr.msra.gmra.mrb[0].mxu1 %v154_v55 }
 0x1d8   :  { %v225_v60 = vpop.f32.mrb[0].mxu1 }
 0x1d9   :  { %v226_v61 = vadd.f32 %v324_v59, %v225_v60  ;;  %v404_v62 = vpop.f32.mrb[1].mxu1 }
 0x1db   :  { %v229_v63 = vmax.f32 %v226_v61, 0.0 }
 0x1dd   :  { %438 = vmatmul.mubr.f32.vlgmr.msra.gmra.mrb[2].mxu0 %v229_v63 }
 0x2b0   :  { %v300_v2 = vpop.f32.mrb[2].mxu0 }
 0x2b1   :  { %v301_v0 = vadd.f32 %v325_v1, %v300_v2  ;;  %v439_v3 = vpop.f32.mrb[3].mxu0 }
 0x2b3   :  { %v304_v4 = vmax.f32 %v301_v0, 0.0 }
 0x2b5   :  { %305 = vst [vmem:[#allocation7] sm:$0xff] %v304_v4 }
 0x2b6   :  { %554 = shalt.err (!%p551_p6)
}
 0x2b7   :  { %s555_s10 = scalar_lea.hbm %s659_s2, 128 }
 0x2b8   :  { %p556_p7 = scmp.ne.s32.totalorder %s659_s2, %s555_s10  ;;  %p559_p8 = scmp.lt.u32.totalorder %s555_s10, %s659_s2 }
 0x2ba   :  { %p561_p9 = pnand %p559_p8, %p556_p7 }
 0x2bc   :  { %564 = shalt.err (!%p561_p9)
}
 0x2bd   :  { %315 = dma.vmem_to_hbm [thread:$0]  %s313_s6, 128, %s659_s2, [#allocation4]  }
 0x2be   :  { %569 = dma.done.wait [#allocation4], 128  }
 0x2bf   :  { %570 = vsyncadd [#allocation4], 4294967168 }
 0x2c0   :  { %319 = vsyncpa [#allocation3], 1 }
 0x2c1   :  { %320 = vsyncpa [#allocation6], 1 }
 0x2c2   :  { %321 = vsyncpa [#allocation4], 1 }

</bundles_post_ra>
